<compile_context>
chip_gen: v7x
topology: tpu7x:2x2x1
jax: 0.10.0
libtpu: 0.0.40
codegen_flags: <defaults>
</compile_context>

<pallas_src>
import functools

import jax
import jax.numpy as jnp
from jax.experimental import pallas as pl
from jax.experimental.pallas import tpu as pltpu


_VMEM_CAP = 48 << 20   # within v7x's 64 MiB/TC VMEM; comfortable on v5e/v6e
_SUB = 16              # sublane multiple safe for both f32 (8) and bf16 (16)


def _round_up(x, m):
    return -(-x // m) * m


def _padded_bytes(rows, cols, dtype):
    """VMEM bytes of a (rows, cols) buffer after (sublane, 128-lane) tiling."""
    item = jnp.dtype(dtype).itemsize
    sub = 8 * max(1, 4 // item)            # 8 rows f32, 16 rows bf16 per tile
    return _round_up(max(rows, 1), sub) * _round_up(max(cols, 1), 128) * item


def _successor_kernel(phi_ref, act_ref, w1s_ref, w1a_ref, b1_ref,
                      w2_ref, b2_ref, o_ref):
    wdt = w1s_ref.dtype
    # fc1 split across the two streamed inputs (no wrapper concat); f32 acc.
    h = jnp.dot(phi_ref[...].astype(wdt), w1s_ref[...],
                preferred_element_type=jnp.float32)
    h += jnp.dot(act_ref[...].astype(wdt), w1a_ref[...],
                 preferred_element_type=jnp.float32)
    h = jnp.maximum(h + b1_ref[...], 0.0)
    # fc2: activations cast to the weight dtype for the MXU, accumulate f32.
    out = (jnp.dot(h.astype(w2_ref.dtype), w2_ref[...],
                   preferred_element_type=jnp.float32)
           + b2_ref[...])
    # TODO(synk): F=32 < 128 lanes -> masked vst on the output store; a
    # wrapper-side lane-dense (Bp*F/128, 128) fold is possible but HBM
    # writeback bytes are unchanged, so it is intentionally left out.
    o_ref[...] = out.astype(o_ref.dtype)


def prepare_params(params, compute_dtype=jnp.float32):
    """One-time conversion to kernel-ready form (call outside the hot path).

    Weights are (in, out) and W1 is split at the feature/action boundary so
    the kernel never needs a concatenated input. bf16 weights are MXU-native
    on v5e, v6e and v7x (streamed activations are cast in-kernel); biases
    stay f32 and both matmuls accumulate in f32 regardless of compute_dtype.
    """
    K, H = params["w1"].shape
    F = params["w2"].shape[1]
    return {
        "w1s": params["w1"][:F, :].astype(compute_dtype),   # (F, H)
        "w1a": params["w1"][F:, :].astype(compute_dtype),   # (A, H)
        "b1": params["b1"].reshape(1, H).astype(jnp.float32),
        "w2": params["w2"].astype(compute_dtype),             # (H, F)
        "b2": params["b2"].reshape(1, F).astype(jnp.float32),
    }


@functools.partial(jax.jit, static_argnames=("block_batch", "out_dtype"))
def successor_network(phi_s, action, kparams, *, block_batch=8192,
                      out_dtype=jnp.float32):
    """Pallas-backed forward pass.

    phi_s:   [B, feature_dim]
    action:  [B, action_dim] (one-hot)
    kparams: output of prepare_params()
    returns  [B, feature_dim] in out_dtype (f32 default, matching the module)
    """
    B, F = phi_s.shape
    _, A = action.shape
    Fw, H = kparams["w1s"].shape
    assert Fw == F and kparams["w1a"].shape == (A, H)
    assert block_batch % 512 == 0 and block_batch >= 512, \
        "block_batch must be a multiple of 512"

    # --- batch tile selection --------------------------------------------
    if B > block_batch:
        TB = block_batch
    elif B >= 1024:
        # Keep >=2 grid steps so ("parallel",) can feed both v7x TensorCores.
        TB = _round_up(pl.cdiv(B, 2), _SUB)
    else:
        TB = _round_up(B, _SUB)

    wdt = kparams["w1s"].dtype

    def footprint(tb):
        # Lane/sublane-padded VMEM footprint: 2x buffers for streamed tiles,
        # single-buffered resident weights/biases, plus compiler-temp headroom.
        return (2 * _padded_bytes(tb, F, phi_s.dtype)
                + 2 * _padded_bytes(tb, A, action.dtype)
                + 2 * _padded_bytes(tb, F, out_dtype)
                + _padded_bytes(F, H, wdt) + _padded_bytes(A, H, wdt)
                + _padded_bytes(H, F, wdt)
                + _padded_bytes(1, H, jnp.float32)
                + _padded_bytes(1, F, jnp.float32)
                + (2 << 20))

    while footprint(TB) > _VMEM_CAP and TB > _SUB:
        TB = max(_SUB, _round_up(TB // 2, _SUB))

    Bp = _round_up(B, TB)
    grid = (Bp // TB,)
    if Bp != B:
        phi_p = jnp.pad(phi_s, ((0, Bp - B), (0, 0)))
        act_p = jnp.pad(action, ((0, Bp - B), (0, 0)))
    else:
        phi_p, act_p = phi_s, action

    vmem_limit = int(min(max(footprint(TB), 16 << 20), _VMEM_CAP))

    out = pl.pallas_call(
        _successor_kernel,
        out_shape=jax.ShapeDtypeStruct((Bp, F), out_dtype),
        grid=grid,
        in_specs=[
            # Streamed activation tiles (double-buffered by the pipeline).
            # Add pipeline_mode=pl.Buffered(3) here only if a profile shows
            # exposed input DMA at very large TB.
            pl.BlockSpec((TB, F), lambda i: (i, 0)),   # phi_s
            pl.BlockSpec((TB, A), lambda i: (i, 0)),   # action
            # Resident weights/biases: constant block index -> no re-DMA.
            pl.BlockSpec((F, H), lambda i: (0, 0)),    # W1[:F]
            pl.BlockSpec((A, H), lambda i: (0, 0)),    # W1[F:]
            pl.BlockSpec((1, H), lambda i: (0, 0)),    # b1
            pl.BlockSpec((H, F), lambda i: (0, 0)),    # W2
            pl.BlockSpec((1, F), lambda i: (0, 0)),    # b2
        ],
        out_specs=pl.BlockSpec((TB, F), lambda i: (i, 0)),
        compiler_params=pltpu.CompilerParams(
            dimension_semantics=("parallel",),   # shard batch over v7x TCs
            vmem_limit_bytes=vmem_limit,
        ),
    )(phi_p, act_p, kparams["w1s"], kparams["w1a"], kparams["b1"],
      kparams["w2"], kparams["b2"])

    return out[:B] if Bp != B else out


def init_params(key, feature_dim, action_dim, hidden=256):
    """Matches the module's _init_weights: kaiming_uniform_(nonlinearity='relu')
    for weights, zeros for biases. Weights stored as (in, out)."""
    k1, k2 = jax.random.split(key, 2)

    def kaiming_uniform(k, fan_in, shape):
        gain = jnp.sqrt(2.0)                     # relu gain
        bound = gain * jnp.sqrt(3.0 / fan_in)
        return jax.random.uniform(k, shape, jnp.float32, -bound, bound)

    in1 = feature_dim + action_dim
    return {
        "w1": kaiming_uniform(k1, in1, (in1, hidden)),
        "b1": jnp.zeros((hidden,), jnp.float32),
        "w2": kaiming_uniform(k2, hidden, (hidden, feature_dim)),
        "b2": jnp.zeros((feature_dim,), jnp.float32),
    }


def reference_forward(phi_s, action, params):
    x = jnp.concatenate([phi_s, action], axis=-1)
    h = jnp.maximum(x @ params["w1"] + params["b1"], 0.0)
    return h @ params["w2"] + params["b2"]


if __name__ == "__main__":
    batch, feature_dim, action_dim = 8, 32, 4

    key = jax.random.PRNGKey(0)
    kp, kphi, kact = jax.random.split(key, 3)

    params = init_params(kp, feature_dim, action_dim)
    phi_s = jax.random.normal(kphi, (batch, feature_dim), jnp.float32)
    act_idx = jax.random.randint(kact, (batch,), 0, action_dim)
    action = jax.nn.one_hot(act_idx, action_dim, dtype=jnp.float32)

    ref = reference_forward(phi_s, action, params)

    # f32 path, tight tolerance.
    out = successor_network(phi_s, action, prepare_params(params, jnp.float32))
    out = jax.block_until_ready(out)
    assert out.shape == (batch, feature_dim)
    assert jnp.allclose(out, ref, atol=1e-5, rtol=1e-5)

    # bf16 weight path (MXU-native on v5e/v6e/v7x), f32 accumulation.
    out_bf16 = successor_network(phi_s, action,
                                 prepare_params(params, jnp.bfloat16))
    out_bf16 = jax.block_until_ready(out_bf16)
    assert jnp.allclose(out_bf16, ref, atol=1e-1, rtol=1e-1)

    # Larger batch exercising the >=2-step grid (both v7x TCs), batch padding
    # and resident weights: B=1100 -> TB=560, grid=(2,), 20 padded rows.
    B2 = 1100
    phi2 = jax.random.normal(kphi, (B2, feature_dim), jnp.float32)
    act2 = jax.nn.one_hot(jax.random.randint(kact, (B2,), 0, action_dim),
                          action_dim, dtype=jnp.float32)
    ref2 = reference_forward(phi2, act2, params)

    out2 = successor_network(phi2, act2, prepare_params(params, jnp.float32))
    out2 = jax.block_until_ready(out2)
    assert out2.shape == (B2, feature_dim)
    assert jnp.allclose(out2, ref2, atol=1e-5, rtol=1e-5)

    # Multi-step grid with B > block_batch (TB=512, grid=(3,)).
    out3 = successor_network(phi2, act2, prepare_params(params, jnp.float32),
                             block_batch=512)
    out3 = jax.block_until_ready(out3)
    assert jnp.allclose(out3, ref2, atol=1e-5, rtol=1e-5)

    print("KERNEL_OK")
</pallas_src>

<mosaic_0001>
module attributes {stable_mosaic.version = 11 : i64} {
  func.func @_successor_kernel(%arg0: i32, %arg1: memref<16x32xf32, #tpu.memory_space<vmem>>, %arg2: memref<16x4xf32, #tpu.memory_space<vmem>>, %arg3: memref<32x256xf32, #tpu.memory_space<vmem>>, %arg4: memref<4x256xf32, #tpu.memory_space<vmem>>, %arg5: memref<1x256xf32, #tpu.memory_space<vmem>>, %arg6: memref<256x32xf32, #tpu.memory_space<vmem>>, %arg7: memref<1x32xf32, #tpu.memory_space<vmem>>, %arg8: memref<16x32xf32, #tpu.memory_space<vmem>>) attributes {dimension_semantics = [#tpu.dimension_semantics<parallel>], iteration_bounds = array<i64: 1>, scalar_prefetch = 0 : i64, scratch_operands = 0 : i64, tpu.core_type = #tpu.core_type<tc>, window_params = [{transform_indices = @transform_0, window_bounds = array<i64: 16, 32>}, {transform_indices = @transform_1, window_bounds = array<i64: 16, 4>}, {pipeline_mode = #tpu.pipeline_mode<synchronous>, transform_indices = @transform_2, window_bounds = array<i64: 32, 256>}, {pipeline_mode = #tpu.pipeline_mode<synchronous>, transform_indices = @transform_3, window_bounds = array<i64: 4, 256>}, {pipeline_mode = #tpu.pipeline_mode<synchronous>, transform_indices = @transform_4, window_bounds = array<i64: 1, 256>}, {pipeline_mode = #tpu.pipeline_mode<synchronous>, transform_indices = @transform_5, window_bounds = array<i64: 256, 32>}, {pipeline_mode = #tpu.pipeline_mode<synchronous>, transform_indices = @transform_6, window_bounds = array<i64: 1, 32>}, {transform_indices = @transform_7, window_bounds = array<i64: 16, 32>}]} {
    %c0 = arith.constant 0 : index
    %c0_0 = arith.constant 0 : index
    %0 = vector.load %arg1[%c0, %c0_0] : memref<16x32xf32, #tpu.memory_space<vmem>>, vector<16x32xf32>
    %c0_1 = arith.constant 0 : index
    %c0_2 = arith.constant 0 : index
    %1 = vector.load %arg3[%c0_1, %c0_2] : memref<32x256xf32, #tpu.memory_space<vmem>>, vector<32x256xf32>
    %cst = arith.constant dense<0.000000e+00> : vector<16x256xf32>
    %2 = tpu.matmul %0, %1, %cst {dimension_numbers = #tpu.dot_dimension_numbers<[1], [0], [0], [1], [0, 0, 1, 1], [], []>} : vector<16x32xf32>, vector<32x256xf32>, vector<16x256xf32> -> vector<16x256xf32>
    %c0_3 = arith.constant 0 : index
    %c0_4 = arith.constant 0 : index
    %3 = vector.load %arg2[%c0_3, %c0_4] : memref<16x4xf32, #tpu.memory_space<vmem>>, vector<16x4xf32>
    %c0_5 = arith.constant 0 : index
    %c0_6 = arith.constant 0 : index
    %4 = vector.load %arg4[%c0_5, %c0_6] : memref<4x256xf32, #tpu.memory_space<vmem>>, vector<4x256xf32>
    %cst_7 = arith.constant dense<0.000000e+00> : vector<16x256xf32>
    %5 = tpu.matmul %3, %4, %cst_7 {dimension_numbers = #tpu.dot_dimension_numbers<[1], [0], [0], [1], [0, 0, 1, 1], [], []>} : vector<16x4xf32>, vector<4x256xf32>, vector<16x256xf32> -> vector<16x256xf32>
    %6 = arith.addf %2, %5 : vector<16x256xf32>
    %c0_8 = arith.constant 0 : index
    %c0_9 = arith.constant 0 : index
    %7 = vector.load %arg5[%c0_8, %c0_9] : memref<1x256xf32, #tpu.memory_space<vmem>>, vector<1x256xf32>
    %8 = vector.broadcast %7 : vector<1x256xf32> to vector<16x256xf32>
    %9 = arith.addf %6, %8 : vector<16x256xf32>
    %cst_10 = arith.constant 0.000000e+00 : f32
    %10 = vector.broadcast %cst_10 : f32 to vector<16x256xf32>
    %11 = arith.maximumf %9, %10 : vector<16x256xf32>
    %c0_11 = arith.constant 0 : index
    %c0_12 = arith.constant 0 : index
    %12 = vector.load %arg6[%c0_11, %c0_12] : memref<256x32xf32, #tpu.memory_space<vmem>>, vector<256x32xf32>
    %cst_13 = arith.constant dense<0.000000e+00> : vector<16x32xf32>
    %13 = tpu.matmul %11, %12, %cst_13 {dimension_numbers = #tpu.dot_dimension_numbers<[1], [0], [0], [1], [0, 0, 1, 1], [], []>} : vector<16x256xf32>, vector<256x32xf32>, vector<16x32xf32> -> vector<16x32xf32>
    %c0_14 = arith.constant 0 : index
    %c0_15 = arith.constant 0 : index
    %14 = vector.load %arg7[%c0_14, %c0_15] : memref<1x32xf32, #tpu.memory_space<vmem>>, vector<1x32xf32>
    %15 = vector.broadcast %14 : vector<1x32xf32> to vector<16x32xf32>
    %16 = arith.addf %13, %15 : vector<16x32xf32>
    %c0_16 = arith.constant 0 : index
    %c0_17 = arith.constant 0 : index
    %17 = vector.load %arg8[%c0_16, %c0_17] : memref<16x32xf32, #tpu.memory_space<vmem>>, vector<16x32xf32>
    tpu.vector_store %arg8[%c0_16, %c0_17], %16 {strides = array<i32>} : memref<16x32xf32, #tpu.memory_space<vmem>>, vector<16x32xf32>,
    return
  }
  func.func @transform_0(%arg0: i32) -> (i32, i32) {
    %c0_i32 = arith.constant 0 : i32
    %c0_i32_0 = arith.constant 0 : i32
    return %arg0, %c0_i32 : i32, i32
  }
  func.func @transform_1(%arg0: i32) -> (i32, i32) {
    %c0_i32 = arith.constant 0 : i32
    %c0_i32_0 = arith.constant 0 : i32
    return %arg0, %c0_i32 : i32, i32
  }
  func.func @transform_2(%arg0: i32) -> (i32, i32) {
    %c0_i32 = arith.constant 0 : i32
    %c0_i32_0 = arith.constant 0 : i32
    %c0_i32_1 = arith.constant 0 : i32
    return %c0_i32, %c0_i32_0 : i32, i32
  }
  func.func @transform_3(%arg0: i32) -> (i32, i32) {
    %c0_i32 = arith.constant 0 : i32
    %c0_i32_0 = arith.constant 0 : i32
    %c0_i32_1 = arith.constant 0 : i32
    return %c0_i32, %c0_i32_0 : i32, i32
  }
  func.func @transform_4(%arg0: i32) -> (i32, i32) {
    %c0_i32 = arith.constant 0 : i32
    %c0_i32_0 = arith.constant 0 : i32
    %c0_i32_1 = arith.constant 0 : i32
    return %c0_i32, %c0_i32_0 : i32, i32
  }
  func.func @transform_5(%arg0: i32) -> (i32, i32) {
    %c0_i32 = arith.constant 0 : i32
    %c0_i32_0 = arith.constant 0 : i32
    %c0_i32_1 = arith.constant 0 : i32
    return %c0_i32, %c0_i32_0 : i32, i32
  }
  func.func @transform_6(%arg0: i32) -> (i32, i32) {
    %c0_i32 = arith.constant 0 : i32
    %c0_i32_0 = arith.constant 0 : i32
    %c0_i32_1 = arith.constant 0 : i32
    return %c0_i32, %c0_i32_0 : i32, i32
  }
  func.func @transform_7(%arg0: i32) -> (i32, i32) {
    %c0_i32 = arith.constant 0 : i32
    %c0_i32_0 = arith.constant 0 : i32
    return %arg0, %c0_i32 : i32, i32
  }
}

</mosaic_0001>

<bundles_post_ra>
// kernel: successor_network.1
= control target key start
LH: loop header
LB: loop body
LE: loop exit
PB: predicated region body
PF: predicated region fallthrough
CT: control target
= control target key end

     0   :  { %vm48_vm0 = vcmask 1043456   ;;  %v445_v1 = vmov 0.0   ;;  %vm41_vm1 = vcmask 31744   ;;  %vm130_vm2 = vcmask 261120   ;;  %s641_s3 = inlined_call_operand.vmem [shape: f32[4,256], index: 3, kind: input, shape index: {}]   ;;  %s642_s1 = inlined_call_operand.vmem [shape: f32[16,4], index: 1, kind: input, shape index: {}]   ;;  %s643_s2 = inlined_call_operand.vmem [shape: f32[32,256], index: 2, kind: input, shape index: {}]   ;;  %s644_s5 = inlined_call_operand.vmem [shape: f32[256,32], index: 5, kind: input, shape index: {}]   ;;  %s645_s0 = inlined_call_operand.vmem [shape: f32[16,32], index: 0, kind: input, shape index: {}]   ;;  %s646_s4 = inlined_call_operand.vmem [shape: f32[1,256], index: 4, kind: input, shape index: {}]   ;;  %s647_s6 = inlined_call_operand.vmem [shape: f32[1,32], index: 6, kind: input, shape index: {}]   ;;  %s648_s7 = inlined_call_operand.vmem [shape: f32[16,32], index: 7, kind: output, shape index: {}]  }
   0x1   :  { %v38_v0 = vld [vmem:[%s641_s3] sm:$0xff]  ;;  %117 = vmatprep.mubr.f32.mxu0 %v445_v1  ;;  %v29_v2 = vld [vmem:[%s643_s2 + $0x8] sm:$0xff]  ;;  %v31_v4 = vld [vmem:[%s643_s2 + $0x18] sm:$0xff] }
   0x2   :  { %v40_v3 = vcombine.high %v38_v0, %v38_v0  ;;  %v28_v5 = vld [vmem:[%s643_s2] sm:$0xff]  ;;  %v30_v6 = vld [vmem:[%s643_s2 + $0x10] sm:$0xff]  ;;  %v399_v8 = vpack.c.bf16 %v31_v4, %v29_v2  ;;  %v33_v10 = vld [vmem:[%s643_s2 + $0x28] sm:$0xff] }
   0x3   :  { %v36_v7 = vld [vmem:[%s642_s1] sm:$0xff]  ;;  %v401_v9 = vpack.c.bf16 %v30_v6, %v28_v5  ;;  %v35_v11 = vld [vmem:[%s643_s2 + $0x38] sm:$0xff]  ;;  %v34_v14 = vld [vmem:[%s643_s2 + $0x30] sm:$0xff] }
   0x4   :  { %354 = vmatprep.subr.msk.mxu0 %vm48_vm0, %v40_v3  ;;  %v403_v12 = vpack.c.bf16 %v35_v11, %v33_v10  ;;  %v32_v13 = vld [vmem:[%s643_s2 + $0x20] sm:$0xff]  ;;  %v37_v15 = vld [vmem:[%s642_s1 + $0x8] sm:$0xff]  ;;  %v252_v21 = vld [vmem:[%s644_s5 + $0x90] sm:$0xff]  ;;  %v216_v3 = vlaneseq }
   0x5   :  { %355 = vmatpush1.msk.msra.mxu0 %vm48_vm0, %v38_v0  ;;  %v250_v16 = vld [vmem:[%s644_s5 + $0x80] sm:$0xff]  ;;  %v251_v17 = vld [vmem:[%s644_s5 + $0x88] sm:$0xff]  ;;  %v405_v22 = vpack.c.bf16 %v34_v14, %v32_v13  ;;  %v253_v24 = vld [vmem:[%s644_s5 + $0x98] sm:$0xff] }
   0x6   :  { %356 = vmatmul.mubr.msk.f32.vlgmr.msra.gmra.mrb[0].mxu0 %vm41_vm1, %v36_v7  ;;  %400 = vmatprep.subr.bf16.mxu0 %v399_v8  ;;  %v407_v18 = vpack.c.bf16 %v251_v17, %v250_v16  ;;  %v234_v19 = vld [vmem:[%s644_s5] sm:$0xff]  ;;  %v235_v20 = vld [vmem:[%s644_s5 + $0x8] sm:$0xff]  ;;  %v236_v25 = vld [vmem:[%s644_s5 + $0x10] sm:$0xff]  ;;  %v411_v27 = vpack.c.bf16 %v253_v24, %v252_v21  ;;  %v217_v4 = vshrl.u32 %v216_v3, 7 }
   0x7   :  { %402 = vmatpush1.bf16.msra.mxu0 %v401_v9  ;;  %123 = vmatprep.mubr.f32.mxu0 %v445_v1  ;;  %v409_v23 = vpack.c.bf16 %v235_v20, %v234_v19  ;;  %v237_v26 = vld [vmem:[%s644_s5 + $0x18] sm:$0xff]  ;;  %v254_v28 = vld [vmem:[%s644_s5 + $0xa0] sm:$0xff]  ;;  %v255_v29 = vld [vmem:[%s644_s5 + $0xa8] sm:$0xff] }
   0x8   :  { %404 = vmatprep.subr.bf16.mxu0 %v403_v12  ;;  %408 = vmatprep.subr.bf16.mxu1 %v407_v18  ;;  %v413_v30 = vpack.c.bf16 %v237_v26, %v236_v25  ;;  %v415_v31 = vpack.c.bf16 %v255_v29, %v254_v28  ;;  %v238_v32 = vld [vmem:[%s644_s5 + $0x20] sm:$0xff]  ;;  %v239_v33 = vld [vmem:[%s644_s5 + $0x28] sm:$0xff]  ;;  %v256_v35 = vld [vmem:[%s644_s5 + $0xb0] sm:$0xff]  ;;  %v218_v5 = vsub.s32 0, %v217_v4  ;;  %v222_v7 = vsub.s32 1, %v217_v4 }
   0x9   :  { %410 = vmatpush3.bf16.msra.mxu1 %v409_v23  ;;  %v26_v34 = vld [vmem:[%s645_s0] sm:$0xff]  ;;  %v257_v36 = vld [vmem:[%s644_s5 + $0xb8] sm:$0xff]  ;;  %v417_v37 = vpack.c.bf16 %v239_v33, %v238_v32  ;;  %v240_v39 = vld [vmem:[%s644_s5 + $0x30] sm:$0xff] }
   0xa   :  { %357 = vmatmul.mubr.msk.f32.gmra.mrb[2].mxu0 %vm41_vm1, %v37_v15  ;;  %412 = vmatprep.subr.bf16.mxu1 %v411_v27  ;;  %v419_v38 = vpack.c.bf16 %v257_v36, %v256_v35  ;;  %v241_v40 = vld [vmem:[%s644_s5 + $0x38] sm:$0xff]  ;;  %v27_v41 = vld [vmem:[%s645_s0 + $0x8] sm:$0xff]  ;;  %v258_v42 = vld [vmem:[%s644_s5 + $0xc0] sm:$0xff] }
   0xb   :  { %406 = vmatpush1.bf16.msra.mxu0 %v405_v22  ;;  %201 = vmatprep.mubr.f32.mxu0 %v445_v1  ;;  %v259_v43 = vld [vmem:[%s644_s5 + $0xc8] sm:$0xff]  ;;  %v421_v44 = vpack.c.bf16 %v241_v40, %v240_v39  ;;  %v242_v46 = vld [vmem:[%s644_s5 + $0x40] sm:$0xff]  ;;  %v260_v48 = vld [vmem:[%s644_s5 + $0xd0] sm:$0xff] }
   0xc   :  { %v423_v45 = vpack.c.bf16 %v259_v43, %v258_v42  ;;  %v243_v47 = vld [vmem:[%s644_s5 + $0x48] sm:$0xff]  ;;  %v261_v49 = vld [vmem:[%s644_s5 + $0xd8] sm:$0xff]  ;;  %v244_v52 = vld [vmem:[%s644_s5 + $0x50] sm:$0xff] }
   0xd   :  { %414 = vmatpush3.bf16.msra.mxu1 %v413_v30  ;;  %v425_v50 = vpack.c.bf16 %v243_v47, %v242_v46  ;;  %v427_v51 = vpack.c.bf16 %v261_v49, %v260_v48  ;;  %v245_v53 = vld [vmem:[%s644_s5 + $0x58] sm:$0xff]  ;;  %v262_v54 = vld [vmem:[%s644_s5 + $0xe0] sm:$0xff]  ;;  %v263_v55 = vld [vmem:[%s644_s5 + $0xe8] sm:$0xff] }
   0xe   :  { %358 = vmatmul.mubr.msk.f32.vlgmr.msra.gmra.mrb[0].mxu0 %vm130_vm2, %v26_v34  ;;  %416 = vmatprep.subr.bf16.mxu1 %v415_v31  ;;  %v429_v56 = vpack.c.bf16 %v245_v53, %v244_v52  ;;  %v431_v57 = vpack.c.bf16 %v263_v55, %v262_v54  ;;  %v246_v58 = vld [vmem:[%s644_s5 + $0x60] sm:$0xff]  ;;  %v247_v59 = vld [vmem:[%s644_s5 + $0x68] sm:$0xff]  ;;  %v264_v61 = vld [vmem:[%s644_s5 + $0xf0] sm:$0xff] }
   0xf   :  { %207 = vmatprep.mubr.f32.mxu0 %v445_v1  ;;  %v433_v60 = vpack.c.bf16 %v247_v59, %v246_v58  ;;  %v265_v62 = vld [vmem:[%s644_s5 + $0xf8] sm:$0xff]  ;;  %v248_v0 = vld [vmem:[%s644_s5 + $0x70] sm:$0xff]  ;;  %v214_v6 = vld [vmem:[%s646_s4] sm:$0x3] }
  0x10   :  { %v435_v63 = vpack.c.bf16 %v265_v62, %v264_v61  ;;  %v249_v1 = vld [vmem:[%s644_s5 + $0x78] sm:$0xff]  ;;  %v219_v8 = vrot.slane %v214_v6, %v218_v5  ;;  %v223_v9 = vrot.slane %v214_v6, %v222_v7  ;;  %v360_v23 = vld [vmem:[%s647_s6] ss:$0 sm:$0xff] }
  0x11   :  { %418 = vmatpush3.bf16.msra.mxu1 %v417_v37  ;;  %v437_v2 = vpack.c.bf16 %v249_v1, %v248_v0 }
  0x12   :  { %359 = vmatmul.mubr.msk.f32.gmra.mrb[2].mxu0 %vm130_vm2, %v27_v41  ;;  %420 = vmatprep.subr.bf16.mxu1 %v419_v38 }
  0x15   :  { %422 = vmatpush3.bf16.msra.mxu1 %v421_v44 }
  0x16   :  { %424 = vmatprep.subr.bf16.mxu1 %v423_v45 }
  0x19   :  { %426 = vmatpush3.bf16.msra.mxu1 %v425_v50 }
  0x1a   :  { %428 = vmatprep.subr.bf16.mxu1 %v427_v51 }
  0x1d   :  { %430 = vmatpush3.bf16.msra.mxu1 %v429_v56 }
  0x1e   :  { %432 = vmatprep.subr.bf16.mxu1 %v431_v57 }
  0x21   :  { %434 = vmatpush3.bf16.msra.mxu1 %v433_v60 }
  0x22   :  { %436 = vmatprep.subr.bf16.mxu1 %v435_v63 }
  0x25   :  { %438 = vmatpush3.bf16.msra.mxu1 %v437_v2 }
  0xe1   :  { %v203_v10 = vpop.f32.mrb[0].mxu0 }
  0xe2   :  { %v226_v11 = vadd.f32 %v219_v8, %v203_v10  ;;  %v205_v12 = vpop.f32.mrb[1].mxu0 }
  0xe3   :  { %v227_v13 = vadd.f32 %v223_v9, %v205_v12 }
  0xe4   :  { %v230_v16 = vmax.f32 %v226_v11, 0.0 }
  0xe5   :  { %v209_v14 = vpop.f32.mrb[2].mxu0  ;;  %v231_v15 = vmax.f32 %v227_v13, 0.0 }
  0xe6   :  { %v228_v17 = vadd.f32 %v219_v8, %v209_v14  ;;  %v211_v18 = vpop.f32.mrb[3].mxu0 }
  0xe7   :  { %v229_v19 = vadd.f32 %v223_v9, %v211_v18  ;;  %337 = vmatprep.mubr.f32.mxu1 %v231_v15 }
  0xe8   :  { %338 = vmatmul.mubr.f32.vlgmr.msra.gmra.mrb[0].mxu1 %v230_v16  ;;  %v232_v21 = vmax.f32 %v228_v17, 0.0 }
  0xe9   :  { %v233_v20 = vmax.f32 %v229_v19, 0.0 }
  0xeb   :  { %342 = vmatprep.mubr.f32.mxu1 %v233_v20 }
  0xec   :  { %343 = vmatmul.mubr.f32.gmra.mrb[2].mxu1 %v232_v21 }
 0x1bb   :  { %v393_v22 = vpop.f32.mrb[0].mxu1 }
 0x1bc   :  { %v394_v24 = vpop.f32.mrb[1].mxu1 }
 0x1bd   :  { %v395_v25 = vadd.f32 %v394_v24, %v393_v22 }
 0x1bf   :  { %v340_v26 = vadd.f32 %v395_v25, %v360_v23  ;;  %v396_v27 = vpop.f32.mrb[2].mxu1 }
 0x1c0   :  { %v397_v28 = vpop.f32.mrb[3].mxu1 }
 0x1c1   :  { %348 = vst.msk [vmem:[%s648_s7] sm:$0xff] %vm130_vm2, %v340_v26  ;;  %v398_v29 = vadd.f32 %v397_v28, %v396_v27 }
 0x1c3   :  { %v345_v30 = vadd.f32 %v398_v29, %v360_v23 }
 0x1c5   :  { %349 = vst.msk [vmem:[%s648_s7 + $0x8] sm:$0xff] %vm130_vm2, %v345_v30 }

</bundles_post_ra>
